<compile_context>
chip_gen: v7x
topology: tpu7x:2x2x1
jax: 0.10.0
libtpu: 0.0.40
codegen_flags: <defaults>
</compile_context>

<pallas_src>
import functools
import math

import jax
import jax.numpy as jnp
from jax.experimental import pallas as pl
from jax.experimental.pallas import tpu as pltpu


def _round_up(n, m):
    return ((n + m - 1) // m) * m


def _cdiv(a, b):
    return (a + b - 1) // b


def _vmem_capacity_bytes():
    """Physical VMEM per TensorCore (generation-aware), conservative fallback."""
    try:
        info = pltpu.get_tpu_info()
        cap = getattr(info, "vmem_capacity_bytes", None)
        if cap:
            return int(cap)
    except Exception:
        pass
    return 64 * 1024 * 1024  # v7x-sized conservative default


def _mlp_head_kernel(x_ref, w1_ref, b1_ref, w2_ref, b2_ref, o_ref, acc_ref,
                     *, gelu: str):
    # grid = (j: out tiles, i: batch tiles, k: hidden chunks); k is the reduction.
    k = pl.program_id(2)

    @pl.when(k == 0)
    def _init():
        acc_ref[...] = jnp.zeros_like(acc_ref)

    # Layer 1 on this hidden chunk: MXU matmul, f32 accumulation, bias in f32.
    h = jnp.dot(x_ref[...], w1_ref[...], preferred_element_type=jnp.float32)
    h = h + b1_ref[...]                                 # (1, block_h) broadcast
    if gelu == "tanh":
        # tanh-approx GELU: the transcendental runs on the EUP slot (VALU freed).
        c = math.sqrt(2.0 / math.pi)
        h = 0.5 * h * (1.0 + jnp.tanh(c * (h + 0.044715 * h * h * h)))
    else:
        # Exact erf GELU (torch.nn.GELU default) -- VALU polynomial chain.
        h = 0.5 * h * (1.0 + jax.lax.erf(h * (1.0 / math.sqrt(2.0))))

    # Layer 2 on this hidden chunk, accumulated in the f32 VMEM scratch.
    acc_ref[...] += jnp.dot(h.astype(w2_ref.dtype), w2_ref[...],
                            preferred_element_type=jnp.float32)

    @pl.when(k == pl.num_programs(2) - 1)
    def _finalize():
        o_ref[...] = (acc_ref[...] + b2_ref[...]).astype(o_ref.dtype)


def _choose_tiles(B, in_p, hidden_dim, out_dim, isz, osz, budget, block_b_pref):
    """Pick (block_b, nb, block_h, block_o) minimizing a flops+HBM+overhead score
    subject to a VMEM budget.  Strongly prefers VMEM-resident weights (nk==1)."""
    hid128 = _round_up(hidden_dim, 128)
    out128 = _round_up(out_dim, 128)

    def batch_tile(target):
        target = max(8, min(_round_up(target, 8), _round_up(B, 8)))
        nb = _cdiv(B, target)
        bb = _round_up(_cdiv(B, nb), 8)   # padding waste bounded by 7 rows/tile
        return bb, nb

    def vmem_need(bb, bh, bo):
        return (2 * bb * in_p * isz          # x tile (double-buffered)
                + 2 * in_p * bh * isz        # W1 chunk
                + 2 * bh * bo * isz          # W2 chunk
                + 2 * 8 * bh * 4             # b1 (padded to 8 sublanes)
                + 2 * 8 * bo * 4             # b2 (padded to 8 sublanes)
                + 2 * bb * bo * osz          # output tile
                + bb * bo * 4                # f32 accumulator scratch
                + 6 * bb * bh)               # f32 + bf16 hidden intermediates

    def score(bb, nb, bh, bo):
        hid_p = _round_up(hidden_dim, bh)
        out_p = _round_up(out_dim, bo)
        nk = hid_p // bh
        nj = out_p // bo
        B_p = nb * bb
        x_bytes = nj * B_p * in_p * isz
        w1_bytes = in_p * hid_p * isz * (1 if nk == 1 else nb * nj)
        w2_bytes = hid_p * out_p * isz * (1 if nk == 1 else nb)
        out_bytes = B_p * out_p * osz
        flops = 2 * B_p * (nj * in_p * hid_p + hid_p * out_p)
        nsteps = nj * nb * nk
        # ~650 flop-equivalents per HBM byte, ~3.2e8 per grid-step overhead.
        return flops + 650.0 * (x_bytes + w1_bytes + w2_bytes + out_bytes) \
            + 3.2e8 * nsteps

    bh_cands = [hid128] + [h for h in (4096, 2048, 1024, 512, 256, 128) if h < hid128]
    bo_cands = [out128] + [o for o in (4096, 2048, 1024, 512, 256, 128) if o < out128]
    bb_cands = []
    t = max(8, block_b_pref)
    while t >= 8:
        cand = batch_tile(t)
        if cand not in bb_cands:
            bb_cands.append(cand)
        t //= 2

    best, best_score = None, None
    for bh in bh_cands:
        for bo in bo_cands:
            for bb, nb in bb_cands:
                if vmem_need(bb, bh, bo) > budget:
                    continue
                s = score(bb, nb, bh, bo)
                if best is None or s < best_score:
                    best, best_score = (bb, nb, bh, bo), s
    if best is None:
        bb, nb = batch_tile(8)
        best = (bb, nb, 128, 128)          # last resort: smallest tiles

    bb, nb, bh, bo = best

    # v7x megacore: guarantee >=2 units of "parallel" work when possible.
    nj = _round_up(out_dim, bo) // bo
    if nb * nj == 1:
        if B >= 16:
            bb2, nb2 = batch_tile(_round_up(_cdiv(B, 2), 8))
            if nb2 >= 2 and vmem_need(bb2, bh, bo) <= budget:
                bb, nb = bb2, nb2
        elif _round_up(out_dim, 128) >= 256 and bo >= 256:
            bo = _round_up(_cdiv(_round_up(out_dim, 128), 2), 128)

    return bb, nb, bh, bo


def head_forward(x, params, *, block_b=512, gelu="tanh",
                 compute_dtype=jnp.bfloat16, tile_override=None):
    """x: (B, in_dim); params: w1 (in,hid), b1 (hid,), w2 (hid,out), b2 (out,).

    gelu="tanh" (default) uses the EUP-friendly tanh approximation;
    gelu="erf" matches torch.nn.GELU exactly (used for f32 validation).
    """
    assert gelu in ("tanh", "erf")
    w1, b1, w2, b2 = params["w1"], params["b1"], params["w2"], params["b2"]
    B, in_dim = x.shape
    hidden_dim = w1.shape[1]
    out_dim = w2.shape[1]
    out_dtype = x.dtype

    isz = jnp.dtype(compute_dtype).itemsize
    osz = jnp.dtype(out_dtype).itemsize
    in_p = _round_up(in_dim, 128)

    # Generation-aware VMEM budget: headroom below physical capacity for Mosaic
    # internal scratch/semaphores; ~100 MiB on 128-MiB parts, ~52-56 MiB on v7x.
    cap = _vmem_capacity_bytes()
    vmem_limit = int(max(min(cap - 8 * 1024 * 1024, 100 * 1024 * 1024),
                         32 * 1024 * 1024))
    budget = vmem_limit - 4 * 1024 * 1024

    if tile_override is not None:
        bb_t, bh, bo = tile_override
        bh = _round_up(bh, 128)
        bo = _round_up(bo, 128)
        nb = _cdiv(B, max(8, int(bb_t)))
        bb = _round_up(_cdiv(B, nb), 8)
    else:
        bb, nb, bh, bo = _choose_tiles(B, in_p, hidden_dim, out_dim,
                                       isz, osz, budget, block_b)

    hid_p = _round_up(hidden_dim, bh)
    out_p = _round_up(out_dim, bo)
    nk = hid_p // bh
    nj = out_p // bo
    B_p = nb * bb

    # Zero padding is numerically exact: GELU(0)=0, zero rows/cols add nothing.
    x_p = jnp.pad(x, ((0, B_p - B), (0, in_p - in_dim))).astype(compute_dtype)
    w1_p = jnp.pad(w1, ((0, in_p - in_dim), (0, hid_p - hidden_dim))).astype(compute_dtype)
    b1_p = jnp.pad(b1, (0, hid_p - hidden_dim)).reshape(1, hid_p).astype(jnp.float32)
    w2_p = jnp.pad(w2, ((0, hid_p - hidden_dim), (0, out_p - out_dim))).astype(compute_dtype)
    b2_p = jnp.pad(b2, (0, out_p - out_dim)).reshape(1, out_p).astype(jnp.float32)

    # Honest HBM-traffic estimate for XLA's scheduler.
    w1_reads = 1 if nk == 1 else nb * nj
    w2_reads = 1 if nk == 1 else nb
    cost = pl.CostEstimate(
        flops=int(2 * B_p * (nj * in_p * hid_p + hid_p * out_p)),
        transcendentals=int(B_p * hid_p * nj),
        bytes_accessed=int(nj * B_p * in_p * isz
                           + w1_reads * in_p * hid_p * isz
                           + w2_reads * hid_p * out_p * isz
                           + (b1_p.size + b2_p.size) * 4
                           + B_p * out_p * osz),
    )

    out_padded = pl.pallas_call(
        functools.partial(_mlp_head_kernel, gelu=gelu),
        out_shape=jax.ShapeDtypeStruct((B_p, out_p), out_dtype),
        grid=(nj, nb, nk),
        in_specs=[
            pl.BlockSpec((bb, in_p), lambda j, i, k: (i, 0)),   # x tile
            pl.BlockSpec((in_p, bh), lambda j, i, k: (0, k)),   # W1 (fetched once if nk==1)
            pl.BlockSpec((1, bh), lambda j, i, k: (0, k)),      # b1 chunk
            pl.BlockSpec((bh, bo), lambda j, i, k: (k, j)),     # W2 (fetched once if nk==1)
            pl.BlockSpec((1, bo), lambda j, i, k: (0, j)),      # b2 chunk
        ],
        out_specs=pl.BlockSpec((bb, bo), lambda j, i, k: (i, j)),
        scratch_shapes=[pltpu.VMEM((bb, bo), jnp.float32)],
        compiler_params=pltpu.CompilerParams(
            dimension_semantics=("parallel", "parallel", "arbitrary"),
            vmem_limit_bytes=vmem_limit,
        ),
        cost_estimate=cost,
    )(x_p, w1_p, b1_p, w2_p, b2_p)

    return out_padded[:B, :out_dim]


def init_head_params(key, in_dim, hidden_dim, out_dim):
    """Deterministic init mimicking nn.Linear's U(-1/sqrt(fan_in), 1/sqrt(fan_in))."""
    k1, k2, k3, k4 = jax.random.split(key, 4)
    bound1 = 1.0 / math.sqrt(in_dim)
    bound2 = 1.0 / math.sqrt(hidden_dim)
    return {
        "w1": jax.random.uniform(k1, (in_dim, hidden_dim), jnp.float32, -bound1, bound1),
        "b1": jax.random.uniform(k2, (hidden_dim,), jnp.float32, -bound1, bound1),
        "w2": jax.random.uniform(k3, (hidden_dim, out_dim), jnp.float32, -bound2, bound2),
        "b2": jax.random.uniform(k4, (out_dim,), jnp.float32, -bound2, bound2),
    }


def head_reference(x, params):
    """Pure-JAX reference of the PyTorch forward (exact erf GELU, fp32)."""
    h = x @ params["w1"] + params["b1"]
    h = 0.5 * h * (1.0 + jax.lax.erf(h / math.sqrt(2.0)))
    return h @ params["w2"] + params["b2"]


if __name__ == "__main__":
    key = jax.random.PRNGKey(0)

    # --- case 1: small shapes consistent with the module (single-tile grid) ---
    B, in_dim, hidden_dim, out_dim = 8, 32, 64, 16
    kx, kp, key = jax.random.split(key, 3)
    x = jax.random.normal(kx, (B, in_dim), dtype=jnp.float32)
    params = init_head_params(kp, in_dim, hidden_dim, out_dim)
    ref = head_reference(x, params)

    # f32 + exact erf path: tight check of the torch semantics.
    out_f32 = jax.block_until_ready(
        head_forward(x, params, compute_dtype=jnp.float32, gelu="erf"))
    assert out_f32.shape == (B, out_dim)
    assert jnp.allclose(out_f32, ref, atol=1e-3, rtol=1e-3), "f32/erf mismatch"

    # Default fast path (bf16 MXU + tanh GELU on EUP): relaxed tolerance.
    out_fast = jax.block_until_ready(head_forward(x, params))
    assert out_fast.shape == (B, out_dim)
    assert jnp.allclose(out_fast, ref, atol=5e-2, rtol=5e-2), "bf16/tanh mismatch"

    # --- case 2: force a multi-tile (nj, nb, nk) grid to exercise streaming,
    # accumulation and output tiling (still small shapes) ---
    B2, in2, hid2, out2 = 24, 40, 384, 272
    kx2, kp2, key = jax.random.split(key, 3)
    x2 = jax.random.normal(kx2, (B2, in2), dtype=jnp.float32)
    params2 = init_head_params(kp2, in2, hid2, out2)
    ref2 = head_reference(x2, params2)
    out2_k = jax.block_until_ready(
        head_forward(x2, params2, compute_dtype=jnp.float32, gelu="erf",
                     tile_override=(8, 128, 128)))   # grid = (3, 3, 3)
    assert out2_k.shape == (B2, out2)
    assert jnp.allclose(out2_k, ref2, atol=1e-3, rtol=1e-3), "multi-tile mismatch"

    print("KERNEL_OK")
</pallas_src>

<mosaic_0001>
module attributes {stable_mosaic.version = 11 : i64} {
  func.func @_mlp_head_kernel(%arg0: i32, %arg1: i32, %arg2: i32, %arg3: memref<8x128xf32, #tpu.memory_space<vmem>>, %arg4: memref<128x128xf32, #tpu.memory_space<vmem>>, %arg5: memref<1x128xf32, #tpu.memory_space<vmem>>, %arg6: memref<128x128xf32, #tpu.memory_space<vmem>>, %arg7: memref<1x128xf32, #tpu.memory_space<vmem>>, %arg8: memref<8x128xf32, #tpu.memory_space<vmem>>, %arg9: memref<8x128xf32, #tpu.memory_space<vmem>>) attributes {dimension_semantics = [#tpu.dimension_semantics<parallel>, #tpu.dimension_semantics<parallel>, #tpu.dimension_semantics<arbitrary>], iteration_bounds = array<i64: 1, 1, 1>, scalar_prefetch = 0 : i64, scratch_operands = 1 : i64, tpu.core_type = #tpu.core_type<tc>, window_params = [{transform_indices = @transform_0, window_bounds = array<i64: 8, 128>}, {transform_indices = @transform_1, window_bounds = array<i64: 128, 128>}, {transform_indices = @transform_2, window_bounds = array<i64: 1, 128>}, {transform_indices = @transform_3, window_bounds = array<i64: 128, 128>}, {transform_indices = @transform_4, window_bounds = array<i64: 1, 128>}, {transform_indices = @transform_5, window_bounds = array<i64: 8, 128>}]} {
    %c0_i32 = arith.constant 0 : i32
    %0 = arith.cmpi eq, %arg2, %c0_i32 : i32
    %1 = arith.extui %0 : i1 to i32
    %c0_i32_0 = arith.constant 0 : i32
    %2 = arith.cmpi ne, %1, %c0_i32_0 : i32
    scf.if %2 {
      %cst_18 = arith.constant 0.000000e+00 : f32
      %25 = vector.broadcast %cst_18 : f32 to vector<8x128xf32>
      %c0_19 = arith.constant 0 : index
      %c0_20 = arith.constant 0 : index
      %26 = vector.load %arg9[%c0_19, %c0_20] : memref<8x128xf32, #tpu.memory_space<vmem>>, vector<8x128xf32>
      tpu.vector_store %arg9[%c0_19, %c0_20], %25 {strides = array<i32>} : memref<8x128xf32, #tpu.memory_space<vmem>>, vector<8x128xf32>,
    } else {
    }
    %c0 = arith.constant 0 : index
    %c0_1 = arith.constant 0 : index
    %3 = vector.load %arg3[%c0, %c0_1] : memref<8x128xf32, #tpu.memory_space<vmem>>, vector<8x128xf32>
    %c0_2 = arith.constant 0 : index
    %c0_3 = arith.constant 0 : index
    %4 = vector.load %arg4[%c0_2, %c0_3] : memref<128x128xf32, #tpu.memory_space<vmem>>, vector<128x128xf32>
    %cst = arith.constant dense<0.000000e+00> : vector<8x128xf32>
    %5 = tpu.matmul %3, %4, %cst {dimension_numbers = #tpu.dot_dimension_numbers<[1], [0], [0], [1], [0, 0, 1, 1], [], []>} : vector<8x128xf32>, vector<128x128xf32>, vector<8x128xf32> -> vector<8x128xf32>
    %c0_4 = arith.constant 0 : index
    %c0_5 = arith.constant 0 : index
    %6 = vector.load %arg5[%c0_4, %c0_5] : memref<1x128xf32, #tpu.memory_space<vmem>>, vector<1x128xf32>
    %7 = vector.broadcast %6 : vector<1x128xf32> to vector<8x128xf32>
    %8 = arith.addf %5, %7 : vector<8x128xf32>
    %cst_6 = arith.constant 5.000000e-01 : f32
    %9 = vector.broadcast %cst_6 : f32 to vector<8x128xf32>
    %10 = arith.mulf %9, %8 : vector<8x128xf32>
    %cst_7 = arith.constant 0.707106769 : f32
    %11 = vector.broadcast %cst_7 : f32 to vector<8x128xf32>
    %12 = arith.mulf %8, %11 : vector<8x128xf32>
    %13 = math.erf %12 : vector<8x128xf32>
    %cst_8 = arith.constant 1.000000e+00 : f32
    %14 = vector.broadcast %cst_8 : f32 to vector<8x128xf32>
    %15 = arith.addf %14, %13 : vector<8x128xf32>
    %16 = arith.mulf %10, %15 : vector<8x128xf32>
    %c0_9 = arith.constant 0 : index
    %c0_10 = arith.constant 0 : index
    %17 = vector.load %arg9[%c0_9, %c0_10] : memref<8x128xf32, #tpu.memory_space<vmem>>, vector<8x128xf32>
    %c0_11 = arith.constant 0 : index
    %c0_12 = arith.constant 0 : index
    %18 = vector.load %arg6[%c0_11, %c0_12] : memref<128x128xf32, #tpu.memory_space<vmem>>, vector<128x128xf32>
    %cst_13 = arith.constant dense<0.000000e+00> : vector<8x128xf32>
    %19 = tpu.matmul %16, %18, %cst_13 {dimension_numbers = #tpu.dot_dimension_numbers<[1], [0], [0], [1], [0, 0, 1, 1], [], []>} : vector<8x128xf32>, vector<128x128xf32>, vector<8x128xf32> -> vector<8x128xf32>
    %20 = arith.addf %17, %19 : vector<8x128xf32>
    %c0_14 = arith.constant 0 : index
    %c0_15 = arith.constant 0 : index
    %21 = vector.load %arg9[%c0_14, %c0_15] : memref<8x128xf32, #tpu.memory_space<vmem>>, vector<8x128xf32>
    tpu.vector_store %arg9[%c0_14, %c0_15], %20 {strides = array<i32>} : memref<8x128xf32, #tpu.memory_space<vmem>>, vector<8x128xf32>,
    %c0_i32_16 = arith.constant 0 : i32
    %22 = arith.cmpi eq, %arg2, %c0_i32_16 : i32
    %23 = arith.extui %22 : i1 to i32
    %c0_i32_17 = arith.constant 0 : i32
    %24 = arith.cmpi ne, %23, %c0_i32_17 : i32
    scf.if %24 {
      %c0_18 = arith.constant 0 : index
      %c0_19 = arith.constant 0 : index
      %25 = vector.load %arg9[%c0_18, %c0_19] : memref<8x128xf32, #tpu.memory_space<vmem>>, vector<8x128xf32>
      %c0_20 = arith.constant 0 : index
      %c0_21 = arith.constant 0 : index
      %26 = vector.load %arg7[%c0_20, %c0_21] : memref<1x128xf32, #tpu.memory_space<vmem>>, vector<1x128xf32>
      %27 = vector.broadcast %26 : vector<1x128xf32> to vector<8x128xf32>
      %28 = arith.addf %25, %27 : vector<8x128xf32>
      %c0_22 = arith.constant 0 : index
      %c0_23 = arith.constant 0 : index
      %29 = vector.load %arg8[%c0_22, %c0_23] : memref<8x128xf32, #tpu.memory_space<vmem>>, vector<8x128xf32>
      tpu.vector_store %arg8[%c0_22, %c0_23], %28 {strides = array<i32>} : memref<8x128xf32, #tpu.memory_space<vmem>>, vector<8x128xf32>,
    } else {
    }
    return
  }
  func.func @transform_0(%arg0: i32, %arg1: i32, %arg2: i32) -> (i32, i32) {
    %c0_i32 = arith.constant 0 : i32
    %c0_i32_0 = arith.constant 0 : i32
    return %arg1, %c0_i32 : i32, i32
  }
  func.func @transform_1(%arg0: i32, %arg1: i32, %arg2: i32) -> (i32, i32) {
    %c0_i32 = arith.constant 0 : i32
    %c0_i32_0 = arith.constant 0 : i32
    return %c0_i32, %arg2 : i32, i32
  }
  func.func @transform_2(%arg0: i32, %arg1: i32, %arg2: i32) -> (i32, i32) {
    %c0_i32 = arith.constant 0 : i32
    %c0_i32_0 = arith.constant 0 : i32
    return %c0_i32, %arg2 : i32, i32
  }
  func.func @transform_3(%arg0: i32, %arg1: i32, %arg2: i32) -> (i32, i32) {
    %c0_i32 = arith.constant 0 : i32
    return %arg2, %arg0 : i32, i32
  }
  func.func @transform_4(%arg0: i32, %arg1: i32, %arg2: i32) -> (i32, i32) {
    %c0_i32 = arith.constant 0 : i32
    %c0_i32_0 = arith.constant 0 : i32
    return %c0_i32, %arg0 : i32, i32
  }
  func.func @transform_5(%arg0: i32, %arg1: i32, %arg2: i32) -> (i32, i32) {
    %c0_i32 = arith.constant 0 : i32
    return %arg1, %arg0 : i32, i32
  }
}

</mosaic_0001>

<bundles_post_ra>
// kernel: tpu_custom_call.1
= control target key start
LH: loop header
LB: loop body
LE: loop exit
PB: predicated region body
PF: predicated region fallthrough
CT: control target
= control target key end

     0   :  { %10 = vsyncpa [#allocation4], 0  ;;  %s656_s0 = inlined_call_operand.hbm [shape: f32[8,128], index: 0, kind: input, shape index: {}]   ;;  %s657_s1 = inlined_call_operand.hbm [shape: f32[128,128], index: 1, kind: input, shape index: {}]   ;;  %s658_s2 = inlined_call_operand.vmem [shape: f32[1,128], index: 2, kind: input, shape index: {}]   ;;  %s659_s3 = inlined_call_operand.hbm [shape: f32[128,128], index: 3, kind: input, shape index: {}]   ;;  %s660_s4 = inlined_call_operand.vmem [shape: f32[1,128], index: 4, kind: input, shape index: {}]   ;;  %s661_s5 = inlined_call_operand.hbm [shape: f32[8,128], index: 5, kind: output, shape index: {}]  }
   0x1   :  { %11 = vsyncpa [#allocation7], 0 }
   0x2   :  { %12 = vsyncpa [#allocation5], 0  ;;  %s541_s18 = smov [#allocation6]   ;;  %s447_s22 = scalar_lea.hbm %s657_s1, 2048 }
   0x3   :  { %s28_s19 = sshll.u32 %s541_s18, 4  ;;  %p448_p0 = scmp.ne.s32.totalorder %s657_s1, %s447_s22  ;;  %s29_s19 = int_to_ptr.vmem [resolvable:$true] %s28_s19 }
   0x4   :  { %p451_p1 = scmp.lt.u32.totalorder %s447_s22, %s657_s1 }
   0x6   :  { %p453_p2 = pnand %p451_p1, %p448_p0 }
   0x8   :  { %456 = shalt.err (!%p453_p2)
}
   0x9   :  { %s457_s27 = scalar_lea.vmem %s29_s19, 2048  ;;  %p462_p4 = scmp.lt.s32.totalorder %s29_s19, %s29_s19 }
   0xa   :  { %p458_p3 = scmp.ne.s32.totalorder %s29_s19, %s457_s27  ;;  %p463_p5 = scmp.lt.s32.totalorder %s457_s27, %s457_s27 }
   0xc   :  { %p464_p6 = por %p463_p5, %p462_p4 }
   0xe   :  { %p465_p7 = pnand %p464_p6, %p458_p3 }
  0x10   :  { %468 = shalt.err (!%p465_p7)
}
  0x11   :  { %s542_s28 = smov 128   ;;  %s543_s29 = smov 8  }
  0x12   :  { %34 = dma.hbm_to_vmem [thread:$0]  %s657_s1, 2048, %s29_s19, [#allocation7], %s542_s28, %s542_s28, %s543_s29  }
  0x13   :  { %s544_s7 = smov [#allocation3]   ;;  %s545_s9 = smov [#allocation8]  }
  0x14   :  { %s19_s8 = sshll.u32 %s544_s7, 4  ;;  %s42_s10 = sshll.u32 %s545_s9, 4  ;;  %s20_s8 = int_to_ptr.vmem [resolvable:$true] %s19_s8  ;;  %s43_s10 = int_to_ptr.vmem [resolvable:$true] %s42_s10 }
  0x15   :  { %s469_s13 = scalar_lea.hbm %s656_s0, 128 }
  0x16   :  { %p470_p8 = scmp.ne.s32.totalorder %s656_s0, %s469_s13  ;;  %p473_p9 = scmp.lt.u32.totalorder %s469_s13, %s656_s0 }
  0x18   :  { %p475_p10 = pnand %p473_p9, %p470_p8 }
  0x1a   :  { %478 = shalt.err (!%p475_p10)
}
  0x1b   :  { %s479_s1 = scalar_lea.vmem %s20_s8, 128  ;;  %p484_p12 = scmp.lt.s32.totalorder %s20_s8, %s20_s8 }
  0x1c   :  { %p480_p11 = scmp.ne.s32.totalorder %s20_s8, %s479_s1  ;;  %p485_p13 = scmp.lt.s32.totalorder %s479_s1, %s479_s1 }
  0x1e   :  { %p486_p0 = por %p485_p13, %p484_p12 }
  0x20   :  { %p487_p1 = pnand %p486_p0, %p480_p11 }
  0x22   :  { %490 = shalt.err (!%p487_p1)
}
  0x23   :  { %22 = dma.hbm_to_vmem [thread:$0]  %s656_s0, 128, %s20_s8, [#allocation4]  }
  0x24   :  { %s491_s22 = scalar_lea.hbm %s659_s3, 2048 }
  0x25   :  { %p492_p2 = scmp.ne.s32.totalorder %s659_s3, %s491_s22  ;;  %p495_p3 = scmp.lt.u32.totalorder %s491_s22, %s659_s3 }
  0x27   :  { %p497_p4 = pnand %p495_p3, %p492_p2 }
  0x29   :  { %500 = shalt.err (!%p497_p4)
}
  0x2a   :  { %s501_s27 = scalar_lea.vmem %s43_s10, 2048  ;;  %p506_p6 = scmp.lt.s32.totalorder %s43_s10, %s43_s10 }
  0x2b   :  { %p502_p5 = scmp.ne.s32.totalorder %s43_s10, %s501_s27  ;;  %p507_p7 = scmp.lt.s32.totalorder %s501_s27, %s501_s27 }
  0x2d   :  { %p508_p8 = por %p507_p7, %p506_p6 }
  0x2f   :  { %p509_p9 = pnand %p508_p8, %p502_p5 }
  0x31   :  { %512 = shalt.err (!%p509_p9)
}
  0x32   :  { %48 = dma.hbm_to_vmem [thread:$0]  %s659_s3, 2048, %s43_s10, [#allocation7], %s542_s28, %s542_s28, %s543_s29  }
  0x33   :  { %535 = dma.done.wait [#allocation4], 128  }
  0x34   :  { %536 = vsyncadd [#allocation4], 4294967168 }
  0x35   :  { %537 = dma.done.wait [#allocation7], 4096  }
  0x36   :  { %538 = vsyncadd [#allocation7], 4294963200  ;;  %v546_v0 = vmov 0.0|0.0   ;;  %vm547_vm0 = vmmov 0   ;;  %v548_v1 = vmov 0.0   ;;  %v66_v2 = vld [vmem:[#allocation6] sm:$0xff] }
  0x37   :  { %388 = vmatprep.subr.bf16.mxu0 %v546_v0  ;;  %350 = vmatprep.mubr.msk.f32.mxu0 %vm547_vm0, %v548_v1  ;;  %v67_v3 = vld [vmem:[#allocation6 + $0x8] sm:$0xff]  ;;  %v68_v4 = vld [vmem:[#allocation6 + $0x10] sm:$0xff]  ;;  %v69_v6 = vld [vmem:[#allocation6 + $0x18] sm:$0xff]  ;;  %s549_s7 = smov [#allocation9]  }
  0x38   :  { %412 = vmatprep.subr.bf16.mxu1 %v546_v0  ;;  %385 = vmatprep.mubr.msk.f32.mxu1 %vm547_vm0, %v548_v1  ;;  %v389_v5 = vpack.c.bf16 %v67_v3, %v66_v2  ;;  %v392_v7 = vpack.c.bf16 %v69_v6, %v68_v4  ;;  %v70_v8 = vld [vmem:[#allocation6 + $0x20] sm:$0xff]  ;;  %v71_v9 = vld [vmem:[#allocation6 + $0x28] sm:$0xff]  ;;  %v167_v12 = vld [vmem:[#allocation8 + $0x10] sm:$0xff]  ;;  %s272_s8 = sshll.u32 %s549_s7, 4  ;;  %s273_s8 = int_to_ptr.vmem [resolvable:$true] %s272_s8 }
  0x39   :  { %v165_v10 = vld [vmem:[#allocation8] sm:$0xff]  ;;  %v166_v11 = vld [vmem:[#allocation8 + $0x8] sm:$0xff]  ;;  %v168_v13 = vld [vmem:[#allocation8 + $0x18] sm:$0xff]  ;;  %v395_v14 = vpack.c.bf16 %v71_v9, %v70_v8  ;;  %p518_p11 = scmp.lt.s32.totalorder %s273_s8, %s273_s8 }
  0x3a   :  { %390 = vmatpush3.bf16.msra.mxu0 %v389_v5  ;;  %v413_v15 = vpack.c.bf16 %v166_v11, %v165_v10  ;;  %v72_v16 = vld [vmem:[#allocation6 + $0x30] sm:$0xff]  ;;  %v73_v17 = vld [vmem:[#allocation6 + $0x38] sm:$0xff]  ;;  %v416_v18 = vpack.c.bf16 %v168_v13, %v167_v12  ;;  %v169_v19 = vld [vmem:[#allocation8 + $0x20] sm:$0xff] }
  0x3b   :  { %391 = vmatprep.subr.bf16.mxu0 %v546_v0  ;;  %v170_v20 = vld [vmem:[#allocation8 + $0x28] sm:$0xff]  ;;  %v398_v21 = vpack.c.bf16 %v73_v17, %v72_v16  ;;  %v74_v22 = vld [vmem:[#allocation6 + $0x40] sm:$0xff]  ;;  %v76_v26 = vld [vmem:[#allocation6 + $0x50] sm:$0xff] }
  0x3c   :  { %414 = vmatpush3.bf16.msra.mxu1 %v413_v15  ;;  %v75_v23 = vld [vmem:[#allocation6 + $0x48] sm:$0xff]  ;;  %v419_v24 = vpack.c.bf16 %v170_v20, %v169_v19  ;;  %v77_v27 = vld [vmem:[#allocation6 + $0x58] sm:$0xff]  ;;  %v78_v29 = vld [vmem:[#allocation6 + $0x60] sm:$0xff] }
  0x3d   :  { %415 = vmatprep.subr.bf16.mxu1 %v546_v0  ;;  %v401_v25 = vpack.c.bf16 %v75_v23, %v74_v22  ;;  %v404_v28 = vpack.c.bf16 %v77_v27, %v76_v26  ;;  %v79_v30 = vld [vmem:[#allocation6 + $0x68] sm:$0xff]  ;;  %v80_v32 = vld [vmem:[#allocation6 + $0x70] sm:$0xff]  ;;  %v81_v33 = vld [vmem:[#allocation6 + $0x78] sm:$0xff] }
  0x3e   :  { %393 = vmatpush3.bf16.msra.mxu0 %v392_v7  ;;  %v407_v31 = vpack.c.bf16 %v79_v30, %v78_v29  ;;  %v410_v34 = vpack.c.bf16 %v81_v33, %v80_v32  ;;  %v65_v35 = vld [vmem:[#allocation3] sm:$0xff]  ;;  %v171_v36 = vld [vmem:[#allocation8 + $0x30] sm:$0xff]  ;;  %v173_v39 = vld [vmem:[#allocation8 + $0x40] sm:$0xff] }
  0x3f   :  { %394 = vmatprep.subr.bf16.mxu0 %v546_v0  ;;  %v172_v37 = vld [vmem:[#allocation8 + $0x38] sm:$0xff]  ;;  %v174_v40 = vld [vmem:[#allocation8 + $0x48] sm:$0xff]  ;;  %v175_v42 = vld [vmem:[#allocation8 + $0x50] sm:$0xff] }
  0x40   :  { %417 = vmatpush3.bf16.msra.mxu1 %v416_v18  ;;  %v422_v38 = vpack.c.bf16 %v172_v37, %v171_v36  ;;  %v425_v41 = vpack.c.bf16 %v174_v40, %v173_v39  ;;  %v176_v43 = vld [vmem:[#allocation8 + $0x58] sm:$0xff]  ;;  %v177_v45 = vld [vmem:[#allocation8 + $0x60] sm:$0xff]  ;;  %v178_v46 = vld [vmem:[#allocation8 + $0x68] sm:$0xff] }
  0x41   :  { %418 = vmatprep.subr.bf16.mxu1 %v546_v0  ;;  %v428_v44 = vpack.c.bf16 %v176_v43, %v175_v42  ;;  %v431_v47 = vpack.c.bf16 %v178_v46, %v177_v45  ;;  %v179_v48 = vld [vmem:[#allocation8 + $0x70] sm:$0xff]  ;;  %v180_v49 = vld [vmem:[#allocation8 + $0x78] sm:$0xff] }
  0x42   :  { %396 = vmatpush3.bf16.msra.mxu0 %v395_v14  ;;  %v434_v50 = vpack.c.bf16 %v180_v49, %v179_v48  ;;  %v282_v51 = vld [vmem:[%s658_s2] ss:$0 sm:$0xff]  ;;  %s513_s2 = scalar_lea.vmem %s273_s8, 128 }
  0x43   :  { %397 = vmatprep.subr.bf16.mxu0 %v546_v0  ;;  %v283_v60 = vld [vmem:[%s660_s4] ss:$0 sm:$0xff]  ;;  %p514_p10 = scmp.ne.s32.totalorder %s273_s8, %s513_s2  ;;  %p519_p12 = scmp.lt.s32.totalorder %s513_s2, %s513_s2 }
  0x44   :  { %420 = vmatpush3.bf16.msra.mxu1 %v419_v24 }
  0x45   :  { %421 = vmatprep.subr.bf16.mxu1 %v546_v0  ;;  %p520_p13 = por %p519_p12, %p518_p11 }
  0x46   :  { %399 = vmatpush3.bf16.msra.mxu0 %v398_v21 }
  0x47   :  { %400 = vmatprep.subr.bf16.mxu0 %v546_v0  ;;  %p521_p0 = pnand %p520_p13, %p514_p10 }
  0x48   :  { %423 = vmatpush3.bf16.msra.mxu1 %v422_v38 }
  0x49   :  { %424 = vmatprep.subr.bf16.mxu1 %v546_v0 }
  0x4a   :  { %402 = vmatpush3.bf16.msra.mxu0 %v401_v25 }
  0x4b   :  { %403 = vmatprep.subr.bf16.mxu0 %v546_v0 }
  0x4c   :  { %426 = vmatpush3.bf16.msra.mxu1 %v425_v41 }
  0x4d   :  { %427 = vmatprep.subr.bf16.mxu1 %v546_v0 }
  0x4e   :  { %405 = vmatpush3.bf16.msra.mxu0 %v404_v28 }
  0x4f   :  { %406 = vmatprep.subr.bf16.mxu0 %v546_v0 }
  0x50   :  { %429 = vmatpush3.bf16.msra.mxu1 %v428_v44 }
  0x51   :  { %430 = vmatprep.subr.bf16.mxu1 %v546_v0 }
  0x52   :  { %408 = vmatpush3.bf16.msra.mxu0 %v407_v31 }
  0x53   :  { %409 = vmatprep.subr.bf16.mxu0 %v546_v0 }
  0x54   :  { %432 = vmatpush3.bf16.msra.mxu1 %v431_v47 }
  0x55   :  { %433 = vmatprep.subr.bf16.mxu1 %v546_v0 }
  0x56   :  { %411 = vmatpush3.bf16.msra.mxu0 %v410_v34 }
  0x58   :  { %435 = vmatpush3.bf16.msra.mxu1 %v434_v50 }
  0x59   :  { %351 = vmatmul.mubr.f32.vlgmr.msra.gmra.mrb[0].mxu0 %v65_v35 }
 0x12c   :  { %v155_v52 = vpop.f32.mrb[0].mxu0 }
 0x12d   :  { %v156_v53 = vadd.f32 %v282_v51, %v155_v52  ;;  %v352_v54 = vpop.f32.mrb[1].mxu0 }
 0x12f   :  { %v160_v55 = vmul.f32 0.70710677, %v156_v53  ;;  %v159_v57 = vmul.f32 0.5, %v156_v53 }
 0x131   :  { %445 = verf.f32 %v160_v55 }
 0x13b   :  { %v446_v56 = vpop.eup %445 }
 0x13c   :  { %v162_v58 = vadd.f32 1.0, %v446_v56 }
 0x13e   :  { %v163_v59 = vmul.f32 %v162_v58, %v159_v57 }
 0x140   :  { %386 = vmatmul.mubr.f32.vlgmr.msra.gmra.mrb[0].mxu1 %v163_v59 }
 0x213   :  { %v247_v61 = vpop.f32.mrb[0].mxu1 }
 0x214   :  { %v264_v62 = vadd.f32 %v283_v60, %v247_v61  ;;  %v387_v63 = vpop.f32.mrb[1].mxu1 }
 0x216   :  { %265 = vst [vmem:[#allocation9] sm:$0xff] %v264_v62 }
 0x217   :  { %524 = shalt.err (!%p521_p0)
}
 0x218   :  { %s525_s11 = scalar_lea.hbm %s661_s5, 128 }
 0x219   :  { %p526_p1 = scmp.ne.s32.totalorder %s661_s5, %s525_s11  ;;  %p529_p2 = scmp.lt.u32.totalorder %s525_s11, %s661_s5 }
 0x21b   :  { %p531_p3 = pnand %p529_p2, %p526_p1 }
 0x21d   :  { %534 = shalt.err (!%p531_p3)
}
 0x21e   :  { %275 = dma.vmem_to_hbm [thread:$0]  %s273_s8, 128, %s661_s5, [#allocation5]  }
 0x21f   :  { %539 = dma.done.wait [#allocation5], 128  }
 0x220   :  { %540 = vsyncadd [#allocation5], 4294967168 }
 0x221   :  { %279 = vsyncpa [#allocation4], 1 }
 0x222   :  { %280 = vsyncpa [#allocation7], 1 }
 0x223   :  { %281 = vsyncpa [#allocation5], 1 }

</bundles_post_ra>
